<compile_context>
chip_gen: v6e
topology: v6e:2x2x1
jax: 0.10.0
libtpu: 0.0.40
codegen_flags: <defaults>
</compile_context>

<pallas_src>
import math

import jax
import jax.numpy as jnp
from jax.experimental import pallas as pl
from jax.experimental.pallas import tpu as pltpu


# ----------------------------------------------------------------------------
# Generic helpers
# ----------------------------------------------------------------------------
_VMEM_LIMIT = 62 * 1024 * 1024          # <= physical VMEM on v5e/v6e/v7x


def _vmem_budget():
    """Per-kernel working-set budget used for tile selection."""
    try:
        cap = pltpu.get_tpu_info().vmem_capacity_bytes
    except Exception:
        cap = 64 * 1024 * 1024          # conservative default (v7x-sized)
    return min(int(cap * 0.45), 48 * 1024 * 1024)


def _pick_tile(dim, candidates):
    """Largest candidate that evenly divides `dim`, else the full dim."""
    for c in candidates:
        if dim >= c and dim % c == 0:
            return c
    return dim


def _cparams(semantics):
    return pltpu.CompilerParams(dimension_semantics=semantics,
                                vmem_limit_bytes=_VMEM_LIMIT)


def _apply_act(y, act):
    if act == "relu":
        return jnp.maximum(y, 0.0)
    if act == "tanh":
        return jnp.tanh(y)
    if act == "gelu":
        # exact (erf-based) GELU as used by BERT
        return 0.5 * y * (1.0 + jax.lax.erf(y * (1.0 / math.sqrt(2.0))))
    return y


# ----------------------------------------------------------------------------
# Weight-resident matmul (+bias +activation, optional fused residual+LayerNorm)
# ----------------------------------------------------------------------------
def _make_wres_kernel(act, fuse_ln):
    if fuse_ln:
        def kernel(x_ref, w_ref, b_ref, r_ref, g_ref, bt_ref, o_ref):
            y = jnp.dot(x_ref[...], w_ref[...],
                        preferred_element_type=jnp.float32)
            y = _apply_act(y + b_ref[...].astype(jnp.float32), act)
            y = y + r_ref[...].astype(jnp.float32)          # residual add
            mean = jnp.mean(y, axis=-1, keepdims=True)
            var = jnp.mean(jnp.square(y - mean), axis=-1, keepdims=True)
            y = (y - mean) * jax.lax.rsqrt(var + 1e-12)
            y = (y * g_ref[...].astype(jnp.float32)
                 + bt_ref[...].astype(jnp.float32))
            o_ref[...] = y.astype(o_ref.dtype)
    else:
        def kernel(x_ref, w_ref, b_ref, o_ref):
            y = jnp.dot(x_ref[...], w_ref[...],
                        preferred_element_type=jnp.float32)
            y = _apply_act(y + b_ref[...].astype(jnp.float32), act)
            o_ref[...] = y.astype(o_ref.dtype)
    return kernel


def _wres_bytes(tm, K, N, fuse_ln):
    w = 2 * K * N * 2                    # double-buffered bf16 weight
    x = 2 * tm * K * 2                   # double-buffered bf16 activations
    o = 2 * tm * N * 2                   # double-buffered bf16 output
    r = 2 * tm * N * 2 if fuse_ln else 0
    tmp = 2 * tm * N * 4                 # in-kernel f32 intermediates
    return w + x + o + r + tmp


def _choose_tm(M, K, N, fuse_ln, budget):
    cands = []
    if M <= 1024:
        cands.append(M)
    cands += [c for c in (1024, 512, 256, 128, 64, 32, 16, 8)
              if c < M and M % c == 0]
    for tm in cands:
        if _wres_bytes(tm, K, N, fuse_ln) <= budget:
            return tm
    return None


# ----------------------------------------------------------------------------
# Fallback K-tiled matmul (only used if the whole weight does not fit VMEM)
# ----------------------------------------------------------------------------
def _make_tiled_kernel(act):
    def kernel(x_ref, w_ref, b_ref, o_ref, acc_ref):
        k = pl.program_id(2)

        @pl.when(k == 0)
        def _():
            acc_ref[...] = jnp.zeros_like(acc_ref)

        acc_ref[...] += jnp.dot(x_ref[...], w_ref[...],
                                preferred_element_type=jnp.float32)

        @pl.when(k == pl.num_programs(2) - 1)
        def _():
            y = _apply_act(acc_ref[...] + b_ref[...].astype(jnp.float32), act)
            o_ref[...] = y.astype(o_ref.dtype)
    return kernel


def _linear_tiled(xb, wb, bb, act, out_dtype, M, K, N):
    tm = _pick_tile(M, (256, 128))
    tn = _pick_tile(N, (512, 256, 128))
    tk = _pick_tile(K, (512, 256, 128))
    grid = (M // tm, N // tn, K // tk)
    return pl.pallas_call(
        _make_tiled_kernel(act),
        out_shape=jax.ShapeDtypeStruct((M, N), out_dtype),
        grid_spec=pltpu.PrefetchScalarGridSpec(
            num_scalar_prefetch=0,
            grid=grid,
            in_specs=[
                pl.BlockSpec((tm, tk), lambda i, j, k: (i, k)),
                pl.BlockSpec((tk, tn), lambda i, j, k: (k, j)),
                pl.BlockSpec((1, tn), lambda i, j, k: (0, j)),
            ],
            out_specs=pl.BlockSpec((tm, tn), lambda i, j, k: (i, j)),
            scratch_shapes=[pltpu.VMEM((tm, tn), jnp.float32)],
        ),
        compiler_params=_cparams(("parallel", "parallel", "arbitrary")),
    )(xb, wb, bb)


def linear(x, w, b, act="none", out_dtype=None, ln=None):
    """y = act(x @ w + b); optionally fused y = LayerNorm(y + ln['residual']).

    x:[M,K], w:[K,N], b:[N] -> [M,N].  bf16 MXU operands, f32 accumulation.
    Weight-resident (full-K, full-N) tiling whenever the weight fits VMEM.
    """
    M, K = x.shape
    K2, N = w.shape
    assert K == K2
    out_dtype = x.dtype if out_dtype is None else out_dtype

    xb = x.astype(jnp.bfloat16)
    wb = w.astype(jnp.bfloat16)
    bb = b.reshape(1, N).astype(jnp.float32)
    fuse_ln = ln is not None

    tm = _choose_tm(M, K, N, fuse_ln, _vmem_budget())
    if tm is not None:
        in_specs = [
            pl.BlockSpec((tm, K), lambda i: (i, 0)),
            pl.BlockSpec((K, N), lambda i: (0, 0)),   # weight: HBM-read-once
            pl.BlockSpec((1, N), lambda i: (0, 0)),
        ]
        args = [xb, wb, bb]
        if fuse_ln:
            in_specs += [
                pl.BlockSpec((tm, N), lambda i: (i, 0)),
                pl.BlockSpec((1, N), lambda i: (0, 0)),
                pl.BlockSpec((1, N), lambda i: (0, 0)),
            ]
            args += [ln["residual"].astype(jnp.bfloat16),
                     ln["gamma"].reshape(1, N).astype(jnp.float32),
                     ln["beta"].reshape(1, N).astype(jnp.float32)]
        return pl.pallas_call(
            _make_wres_kernel(act, fuse_ln),
            out_shape=jax.ShapeDtypeStruct((M, N), out_dtype),
            grid=(M // tm,),
            in_specs=in_specs,
            out_specs=pl.BlockSpec((tm, N), lambda i: (i, 0)),
            compiler_params=_cparams(("parallel",)),
        )(*args)

    # Fallback: weight too big for VMEM -> K-tiled accumulator kernel
    y = _linear_tiled(xb, wb, bb, act, out_dtype, M, K, N)
    if fuse_ln:
        y = layernorm(y, ln["gamma"], ln["beta"], residual=ln["residual"],
                      out_dtype=out_dtype)
    return y


# ----------------------------------------------------------------------------
# Standalone LayerNorm kernel (embeddings LN + fallback path)
# ----------------------------------------------------------------------------
def _ln_store(x, g_ref, b_ref, o_ref):
    mean = jnp.mean(x, axis=-1, keepdims=True)
    var = jnp.mean(jnp.square(x - mean), axis=-1, keepdims=True)
    y = (x - mean) * jax.lax.rsqrt(var + 1e-12)
    y = y * g_ref[...].astype(jnp.float32) + b_ref[...].astype(jnp.float32)
    o_ref[...] = y.astype(o_ref.dtype)


def _make_ln_kernel(with_residual):
    if with_residual:
        def kernel(x_ref, r_ref, g_ref, b_ref, o_ref):
            x = x_ref[...].astype(jnp.float32) + r_ref[...].astype(jnp.float32)
            _ln_store(x, g_ref, b_ref, o_ref)
    else:
        def kernel(x_ref, g_ref, b_ref, o_ref):
            _ln_store(x_ref[...].astype(jnp.float32), g_ref, b_ref, o_ref)
    return kernel


def layernorm(x, g, b, residual=None, out_dtype=None):
    """LayerNorm over last dim (eps=1e-12); residual added inside the kernel."""
    M, H = x.shape
    out_dtype = x.dtype if out_dtype is None else out_dtype
    tm = _pick_tile(M, (512, 256, 128))       # capped at 512 (v5e-friendly)
    row_spec = pl.BlockSpec((tm, H), lambda i: (i, 0))
    vec_spec = pl.BlockSpec((1, H), lambda i: (0, 0))
    inputs = (x,) if residual is None else (x, residual)
    in_specs = [row_spec] * len(inputs) + [vec_spec, vec_spec]
    return pl.pallas_call(
        _make_ln_kernel(residual is not None),
        out_shape=jax.ShapeDtypeStruct((M, H), out_dtype),
        grid=(M // tm,),
        in_specs=in_specs,
        out_specs=row_spec,
        compiler_params=_cparams(("parallel",)),
    )(*inputs, g.reshape(1, H).astype(jnp.float32),
      b.reshape(1, H).astype(jnp.float32))


# ----------------------------------------------------------------------------
# Attention: grid over (batch, query block), reads the fused QKV buffer
# directly (no XLA transposes), writes a lane-dense [B, S, H] context.
# ----------------------------------------------------------------------------
def _make_attn_kernel(nH, dH):
    scale = 1.0 / math.sqrt(dH)

    def kernel(q_ref, k_ref, v_ref, m_ref, o_ref):
        tq = q_ref.shape[1]
        S = k_ref.shape[1]
        q = q_ref[0].reshape(tq, nH, dH)             # bf16
        k = k_ref[0].reshape(S, nH, dH)
        v = v_ref[0].reshape(S, nH, dH)
        mask = m_ref[0].astype(jnp.float32)          # [1, S] additive
        s = jnp.einsum("qhd,khd->hqk", q, k,
                       preferred_element_type=jnp.float32) * scale
        s = s + mask[None, :, :]                     # broadcast heads/queries
        s = s - jnp.max(s, axis=-1, keepdims=True)
        p = jnp.exp(s)                               # f32 (reference numerics)
        denom = jnp.sum(p, axis=-1, keepdims=True)
        p = p * pl.reciprocal(denom, approx=True)
        ctx = jnp.einsum("hqk,khd->qhd", p.astype(v.dtype), v,
                         preferred_element_type=jnp.float32)
        o_ref[0] = ctx.reshape(tq, nH * dH).astype(o_ref.dtype)

    return kernel


def multi_head_attention(qkv, add_mask, nH):
    """qkv: [B, S, 3H] (Q|K|V concatenated on last dim); add_mask: [B,1,S].

    Returns context [B, S, H] (lane-dense, directly consumable by o-proj).
    """
    B, S, H3 = qkv.shape
    H = H3 // 3
    dH = H // nH
    tq = _pick_tile(S, (128,))
    q_spec = pl.BlockSpec((1, tq, H), lambda b, qi: (b, qi, 0))
    k_spec = pl.BlockSpec((1, S, H), lambda b, qi: (b, 0, 1))
    v_spec = pl.BlockSpec((1, S, H), lambda b, qi: (b, 0, 2))
    m_spec = pl.BlockSpec((1, 1, S), lambda b, qi: (b, 0, 0))
    o_spec = pl.BlockSpec((1, tq, H), lambda b, qi: (b, qi, 0))
    return pl.pallas_call(
        _make_attn_kernel(nH, dH),
        grid=(B, S // tq),
        in_specs=[q_spec, k_spec, v_spec, m_spec],
        out_specs=o_spec,
        out_shape=jax.ShapeDtypeStruct((B, S, H), qkv.dtype),
        compiler_params=_cparams(("parallel", "parallel")),
    )(qkv, qkv, qkv, add_mask)


# ----------------------------------------------------------------------------
# Fused classification head: pooler(tanh) + classifier and MLP(ReLU) stack
# ----------------------------------------------------------------------------
def _make_head_kernel(n_mlp):
    def kernel(*refs):
        cls_ref, pw_ref, pb_ref, cw_ref, cb_ref = refs[:5]
        mlp_refs = refs[5:5 + 2 * n_mlp]
        logits_ref, feat_ref = refs[5 + 2 * n_mlp:]

        cls = cls_ref[...].astype(jnp.float32)                       # [B, H]
        pooled = jnp.tanh(
            jnp.dot(cls, pw_ref[...].astype(jnp.float32),
                    preferred_element_type=jnp.float32)
            + pb_ref[...].astype(jnp.float32))
        # nn.Dropout(hidden_dropout_prob): identity in inference mode
        logits = (jnp.dot(pooled, cw_ref[...].astype(jnp.float32),
                          preferred_element_type=jnp.float32)
                  + cb_ref[...].astype(jnp.float32))

        feat = cls
        for i in range(n_mlp):
            w = mlp_refs[2 * i][...].astype(jnp.float32)
            b = mlp_refs[2 * i + 1][...].astype(jnp.float32)
            feat = jnp.maximum(
                jnp.dot(feat, w, preferred_element_type=jnp.float32) + b, 0.0)

        logits_ref[...] = logits.astype(logits_ref.dtype)
        feat_ref[...] = feat.astype(feat_ref.dtype)
    return kernel


def classification_head(cls, pooler, classifier, mlp):
    B, H = cls.shape
    n_mlp = len(mlp)
    labels = classifier["w"].shape[1]
    Fdim = mlp[-1]["w"].shape[1]
    args = [cls,
            pooler["w"], pooler["b"].reshape(1, -1),
            classifier["w"], classifier["b"].reshape(1, -1)]
    for lin in mlp:
        args += [lin["w"], lin["b"].reshape(1, -1)]
    return pl.pallas_call(
        _make_head_kernel(n_mlp),
        out_shape=(jax.ShapeDtypeStruct((B, labels), jnp.float32),
                   jax.ShapeDtypeStruct((B, Fdim), jnp.float32)),
    )(*args)


# ----------------------------------------------------------------------------
# Parameter construction (deterministic; synthetic — no checkpoint loading)
# ----------------------------------------------------------------------------
# TODO(synk): BertModel.from_pretrained checkpoint loading has no Pallas
# equivalent; weights are initialized deterministically in-script instead.
def _dense(key, din, dout):
    w = jax.random.normal(key, (din, dout), jnp.float32) * 0.02
    b = jnp.zeros((dout,), jnp.float32)
    return {"w": w, "b": b}


def init_params(key, cfg):
    H, I, L = cfg["hidden"], cfg["intermediate"], cfg["layers"]
    keys = jax.random.split(key, 16 + 8 * L)
    ki = iter(range(len(keys)))

    bert = {
        "word_emb": jax.random.normal(keys[next(ki)], (cfg["vocab"], H), jnp.float32) * 0.02,
        "pos_emb": jax.random.normal(keys[next(ki)], (cfg["max_pos"], H), jnp.float32) * 0.02,
        "type_emb": jax.random.normal(keys[next(ki)], (cfg["type_vocab"], H), jnp.float32) * 0.02,
        "emb_ln_g": jnp.ones((H,), jnp.float32),
        "emb_ln_b": jnp.zeros((H,), jnp.float32),
        "layers": [],
        "pooler": _dense(keys[next(ki)], H, H),
    }
    for _ in range(L):
        bert["layers"].append({
            "qkv": _dense(keys[next(ki)], H, 3 * H),   # fused Q|K|V projection
            "o": _dense(keys[next(ki)], H, H),
            "ln1_g": jnp.ones((H,), jnp.float32),
            "ln1_b": jnp.zeros((H,), jnp.float32),
            "ff1": _dense(keys[next(ki)], H, I),
            "ff2": _dense(keys[next(ki)], I, H),
            "ln2_g": jnp.ones((H,), jnp.float32),
            "ln2_b": jnp.zeros((H,), jnp.float32),
        })

    # Pure_Bert head: mlp = [Linear(H, F), ReLU] + (num_mlps-1)*[Linear(F, F), ReLU]
    F = cfg["final_hidden"]
    mlp = [_dense(keys[next(ki)], H, F)]
    for _ in range(cfg["num_mlps"] - 1):
        mlp.append(_dense(keys[next(ki)], F, F))
    classifier = _dense(keys[next(ki)], H, cfg["labels"])

    return {"bert": bert, "mlp": mlp, "classifier": classifier}


# ----------------------------------------------------------------------------
# Forward pass
# ----------------------------------------------------------------------------
def bert_encoder(p, input_ids, token_type_ids, attention_mask, cfg):
    B, S = input_ids.shape
    H, nH = cfg["hidden"], cfg["heads"]

    # TODO(synk): embedding gathers stay in XLA (no rectangular-tile pattern).
    emb = (p["word_emb"][input_ids]
           + p["pos_emb"][jnp.arange(S)][None, :, :]
           + p["type_emb"][token_type_ids])                          # [B, S, H] f32
    x = layernorm(emb.reshape(B * S, H), p["emb_ln_g"], p["emb_ln_b"],
                  out_dtype=jnp.bfloat16)                            # [B*S, H] bf16

    add_mask = ((1.0 - attention_mask.astype(jnp.float32)) * -10000.0
                ).reshape(B, 1, S)                                   # [B, 1, S]

    for layer in p["layers"]:
        # fused QKV projection: one pass over x -> [B*S, 3H]
        qkv = linear(x, layer["qkv"]["w"], layer["qkv"]["b"],
                     out_dtype=jnp.bfloat16)
        # attention reads Q/K/V slabs of the [B, S, 3H] view via BlockSpecs
        ctx = multi_head_attention(qkv.reshape(B, S, 3 * H), add_mask, nH)
        ctx = ctx.reshape(B * S, H)                                  # free reshape
        # o-proj with fused residual-add + LayerNorm
        x = linear(ctx, layer["o"]["w"], layer["o"]["b"], out_dtype=jnp.bfloat16,
                   ln=dict(residual=x, gamma=layer["ln1_g"], beta=layer["ln1_b"]))
        # FFN
        h = linear(x, layer["ff1"]["w"], layer["ff1"]["b"], act="gelu",
                   out_dtype=jnp.bfloat16)
        x = linear(h, layer["ff2"]["w"], layer["ff2"]["b"], out_dtype=jnp.bfloat16,
                   ln=dict(residual=x, gamma=layer["ln2_g"], beta=layer["ln2_b"]))

    return x.reshape(B, S, H)                    # sequence_output


def pure_bert_forward(params, input_ids, token_type_ids, attention_mask, cfg):
    seq = bert_encoder(params["bert"], input_ids, token_type_ids,
                       attention_mask, cfg)
    cls = seq[:, 0]                              # [B, H]
    logits, feature = classification_head(cls, params["bert"]["pooler"],
                                           params["classifier"], params["mlp"])
    return logits, feature


# ----------------------------------------------------------------------------
if __name__ == "__main__":
    # hidden is kept a multiple of 128 so the Q/K/V column-slab BlockSpecs on
    # the [B, S, 3H] buffer stay lane-aligned (as they are for BERT-base H=768).
    cfg = dict(vocab=50, type_vocab=2, max_pos=16,
               hidden=128, heads=4, intermediate=256, layers=2,
               final_hidden=16, num_mlps=2, labels=3)

    key = jax.random.PRNGKey(0)
    kp, ki, kt = jax.random.split(key, 3)
    params = init_params(kp, cfg)

    B, S = 2, 8
    input_ids = jax.random.randint(ki, (B, S), 0, cfg["vocab"], dtype=jnp.int32)
    token_type_ids = jax.random.randint(kt, (B, S), 0, cfg["type_vocab"], dtype=jnp.int32)
    attention_mask = jnp.ones((B, S), dtype=jnp.int32)

    logits, feature = pure_bert_forward(params, input_ids, token_type_ids,
                                        attention_mask, cfg)
    jax.block_until_ready((logits, feature))
    assert logits.shape == (B, cfg["labels"])
    assert feature.shape == (B, cfg["final_hidden"])
    print("KERNEL_OK")
</pallas_src>

<mosaic_0001>
module attributes {stable_mosaic.version = 11 : i64} {
  func.func @kernel(%arg0: i32, %arg1: memref<16x128xf32, #tpu.memory_space<vmem>>, %arg2: memref<1x128xf32, #tpu.memory_space<vmem>>, %arg3: memref<1x128xf32, #tpu.memory_space<vmem>>, %arg4: memref<16x128xbf16, #tpu.memory_space<vmem>>) attributes {dimension_semantics = [#tpu.dimension_semantics<parallel>], iteration_bounds = array<i64: 1>, scalar_prefetch = 0 : i64, scratch_operands = 0 : i64, tpu.core_type = #tpu.core_type<tc>, window_params = [{transform_indices = @transform_0, window_bounds = array<i64: 16, 128>}, {pipeline_mode = #tpu.pipeline_mode<synchronous>, transform_indices = @transform_1, window_bounds = array<i64: 1, 128>}, {pipeline_mode = #tpu.pipeline_mode<synchronous>, transform_indices = @transform_2, window_bounds = array<i64: 1, 128>}, {transform_indices = @transform_3, window_bounds = array<i64: 16, 128>}]} {
    %c0 = arith.constant 0 : index
    %c0_0 = arith.constant 0 : index
    %0 = vector.load %arg1[%c0, %c0_0] : memref<16x128xf32, #tpu.memory_space<vmem>>, vector<16x128xf32>
    %cst = arith.constant dense<0.000000e+00> : vector<16xf32>
    %1 = vector.multi_reduction <add>, %0, %cst [1] : vector<16x128xf32> to vector<16xf32>
    %2 = vector.shape_cast %1 : vector<16xf32> to vector<16x1xf32>
    %cst_1 = arith.constant 1.280000e+02 : f32
    %3 = vector.broadcast %cst_1 : f32 to vector<16x1xf32>
    %4 = arith.divf %2, %3 : vector<16x1xf32>
    %5 = vector.broadcast %4 : vector<16x1xf32> to vector<16x128xf32>
    %6 = arith.subf %0, %5 : vector<16x128xf32>
    %7 = arith.mulf %6, %6 : vector<16x128xf32>
    %cst_2 = arith.constant dense<0.000000e+00> : vector<16xf32>
    %8 = vector.multi_reduction <add>, %7, %cst_2 [1] : vector<16x128xf32> to vector<16xf32>
    %9 = vector.shape_cast %8 : vector<16xf32> to vector<16x1xf32>
    %cst_3 = arith.constant 1.280000e+02 : f32
    %10 = vector.broadcast %cst_3 : f32 to vector<16x1xf32>
    %11 = arith.divf %9, %10 : vector<16x1xf32>
    %12 = vector.broadcast %4 : vector<16x1xf32> to vector<16x128xf32>
    %13 = arith.subf %0, %12 : vector<16x128xf32>
    %cst_4 = arith.constant 9.99999996E-13 : f32
    %14 = vector.broadcast %cst_4 : f32 to vector<16x1xf32>
    %15 = arith.addf %11, %14 : vector<16x1xf32>
    %16 = math.rsqrt %15 : vector<16x1xf32>
    %17 = vector.broadcast %16 : vector<16x1xf32> to vector<16x128xf32>
    %18 = arith.mulf %13, %17 : vector<16x128xf32>
    %c0_5 = arith.constant 0 : index
    %c0_6 = arith.constant 0 : index
    %19 = vector.load %arg2[%c0_5, %c0_6] : memref<1x128xf32, #tpu.memory_space<vmem>>, vector<1x128xf32>
    %20 = vector.broadcast %19 : vector<1x128xf32> to vector<16x128xf32>
    %21 = arith.mulf %18, %20 : vector<16x128xf32>
    %c0_7 = arith.constant 0 : index
    %c0_8 = arith.constant 0 : index
    %22 = vector.load %arg3[%c0_7, %c0_8] : memref<1x128xf32, #tpu.memory_space<vmem>>, vector<1x128xf32>
    %23 = vector.broadcast %22 : vector<1x128xf32> to vector<16x128xf32>
    %24 = arith.addf %21, %23 : vector<16x128xf32>
    %25 = arith.truncf %24 : vector<16x128xf32> to vector<16x128xbf16>
    %c0_9 = arith.constant 0 : index
    %c0_10 = arith.constant 0 : index
    %26 = vector.load %arg4[%c0_9, %c0_10] : memref<16x128xbf16, #tpu.memory_space<vmem>>, vector<16x128xbf16>
    tpu.vector_store %arg4[%c0_9, %c0_10], %25 {strides = array<i32>} : memref<16x128xbf16, #tpu.memory_space<vmem>>, vector<16x128xbf16>,
    return
  }
  func.func @transform_0(%arg0: i32) -> (i32, i32) {
    %c0_i32 = arith.constant 0 : i32
    %c0_i32_0 = arith.constant 0 : i32
    return %arg0, %c0_i32 : i32, i32
  }
  func.func @transform_1(%arg0: i32) -> (i32, i32) {
    %c0_i32 = arith.constant 0 : i32
    %c0_i32_0 = arith.constant 0 : i32
    %c0_i32_1 = arith.constant 0 : i32
    return %c0_i32, %c0_i32_0 : i32, i32
  }
  func.func @transform_2(%arg0: i32) -> (i32, i32) {
    %c0_i32 = arith.constant 0 : i32
    %c0_i32_0 = arith.constant 0 : i32
    %c0_i32_1 = arith.constant 0 : i32
    return %c0_i32, %c0_i32_0 : i32, i32
  }
  func.func @transform_3(%arg0: i32) -> (i32, i32) {
    %c0_i32 = arith.constant 0 : i32
    %c0_i32_0 = arith.constant 0 : i32
    return %arg0, %c0_i32 : i32, i32
  }
}

</mosaic_0001>

<bundles_post_ra>
// kernel: tpu_custom_call.1
= control target key start
LH: loop header
LB: loop body
LE: loop exit
PB: predicated region body
PF: predicated region fallthrough
CT: control target
= control target key end

     0   :  { %8 = vsyncpa [#allocation3], 0  ;;  %s202_s0 = inlined_call_operand.hbm [shape: f32[16,128], index: 0, kind: input, shape index: {}]   ;;  %s203_s1 = inlined_call_operand.vmem [shape: f32[1,128], index: 1, kind: input, shape index: {}]   ;;  %s204_s2 = inlined_call_operand.vmem [shape: f32[1,128], index: 2, kind: input, shape index: {}]   ;;  %s205_s3 = inlined_call_operand.hbm [shape: bf16[16,128], index: 3, kind: output, shape index: {}]  }
   0x1   :  { %9 = vsyncpa [#allocation4], 0  ;;  %s164_s12 = smov [#allocation2]  }
   0x2   :  { %s15_s13 = sshll.u32 %s164_s12, 4  ;;  %s16_s13 = int_to_ptr.vmem [resolvable:$true] %s15_s13 }
   0x3   :  { %s128_s14 = scalar_lea.vmem %s16_s13, 256  ;;  %p133_p1 = scmp.lt.s32.totalorder %s16_s13, %s16_s13 }
   0x4   :  { %p129_p0 = scmp.ne.s32.totalorder %s16_s13, %s128_s14  ;;  %p134_p2 = scmp.lt.s32.totalorder %s128_s14, %s128_s14 }
   0x6   :  { %p135_p3 = por %p134_p2, %p133_p1 }
   0x8   :  { %p136_p4 = pnand %p135_p3, %p129_p0 }
   0xa   :  { %139 = shalt.err (!%p136_p4)
}
   0xb   :  { %s165_s15 = smov 128   ;;  %s166_s16 = smov 8  }
   0xc   :  { %21 = dma.hbm_to_vmem [thread:$0]  %s202_s0, 256, %s16_s13, [#allocation3], %s165_s15, %s165_s15, %s166_s16  }
   0xd   :  { %160 = dma.done.wait [#allocation3], 256  }
   0xe   :  { %161 = vsyncadd [#allocation3], 4294967040  ;;  %v29_v0 = vld [vmem:[#allocation2] sm:$0xff]  ;;  %v30_v1 = vld [vmem:[#allocation2 + $0x8] sm:$0xff]  ;;  %s167_s22 = smov [#allocation5]  }
   0xf   :  { %31 = vadd.xlane.f32.xlu0 %v29_v0  ;;  %v99_v18 = vld [vmem:[%s203_s1] ss:$0 sm:$0xff]  ;;  %s87_s23 = sshll.u32 %s167_s22, 4  ;;  %s88_s23 = int_to_ptr.vmem [resolvable:$true] %s87_s23 }
  0x10   :  { %v100_v22 = vld [vmem:[%s204_s2] ss:$0 sm:$0xff]  ;;  %s140_s24 = scalar_lea.vmem %s88_s23, 128  ;;  %p145_p6 = scmp.lt.s32.totalorder %s88_s23, %s88_s23 }
  0x11   :  { %p141_p5 = scmp.ne.s32.totalorder %s88_s23, %s140_s24  ;;  %p146_p7 = scmp.lt.s32.totalorder %s140_s24, %s140_s24 }
  0x13   :  { %33 = vadd.xlane.f32.xlu0 %v30_v1  ;;  %p147_p8 = por %p146_p7, %p145_p6 }
  0x15   :  { %p148_p9 = pnand %p147_p8, %p141_p5 }
  0x98   :  { %v32_v2 = vpop.xlane.xlu0 %31 }
  0x99   :  { %v36_v3 = vmul.f32 0.0078125, %v32_v2 }
  0x9b   :  { %v38_v4 = vsub.f32 %v29_v0, %v36_v3 }
  0x9c   :  { %v34_v5 = vpop.xlane.xlu0 %33 }
  0x9d   :  { %v37_v6 = vmul.f32 0.0078125, %v34_v5  ;;  %v40_v7 = vmul.f32 %v38_v4, %v38_v4 }
  0x9f   :  { %v39_v8 = vsub.f32 %v30_v1, %v37_v6  ;;  %42 = vadd.xlane.f32.xlu1 %v40_v7 }
  0xa1   :  { %v41_v9 = vmul.f32 %v39_v8, %v39_v8 }
  0xa3   :  { %44 = vadd.xlane.f32.xlu1 %v41_v9 }
 0x128   :  { %v43_v10 = vpop.xlane.xlu1 %42 }
 0x129   :  { %v46_v11 = vmul.f32 0.0078125, %v43_v10 }
 0x12b   :  { %v48_v12 = vadd.f32 1e-12, %v46_v11 }
 0x12c   :  { %v45_v13 = vpop.xlane.xlu1 %44 }
 0x12d   :  { %116 = vrsqrt.f32 %v48_v12  ;;  %v47_v14 = vmul.f32 0.0078125, %v45_v13 }
 0x12f   :  { %v49_v15 = vadd.f32 1e-12, %v47_v14 }
 0x131   :  { %118 = vrsqrt.f32 %v49_v15 }
 0x13a   :  { %v117_v16 = vpop.eup %116 }
 0x13b   :  { %v52_v17 = vmul.f32 %v117_v16, %v38_v4 }
 0x13d   :  { %v61_v21 = vmul.f32 %v99_v18, %v52_v17 }
 0x13e   :  { %v119_v19 = vpop.eup %118 }
 0x13f   :  { %v53_v20 = vmul.f32 %v119_v19, %v39_v8  ;;  %v70_v24 = vadd.f32 %v100_v22, %v61_v21 }
 0x141   :  { %v62_v23 = vmul.f32 %v99_v18, %v53_v20 }
 0x143   :  { %v71_v25 = vadd.f32 %v100_v22, %v62_v23 }
 0x145   :  { %v108_v26 = vpack.c.bf16 %v71_v25, %v70_v24 }
 0x147   :  { %109 = vst [vmem:[#allocation5] sm:$0xff] %v108_v26  }
 0x148   :  { %151 = shalt.err (!%p148_p9)
}
 0x149   :  { %s168_s1 = smov 64   ;;  %s169_s25 = smov 4  }
 0x14a   :  { %93 = dma.vmem_to_hbm [thread:$0]  %s88_s23, 128, %s205_s3, [#allocation4], %s168_s1, %s168_s1, %s169_s25  }
 0x14b   :  { %162 = dma.done.wait [#allocation4], 128  }
 0x14c   :  { %163 = vsyncadd [#allocation4], 4294967168 }
 0x14d   :  { %97 = vsyncpa [#allocation3], 1 }
 0x14e   :  { %98 = vsyncpa [#allocation4], 1 }

</bundles_post_ra>
